<compile_context>
chip_gen: v5e
topology: v5e:2x2
jax: 0.10.0
libtpu: 0.0.40
codegen_flags: <defaults>
</compile_context>

<pallas_src>
import functools

import jax
import jax.numpy as jnp
from jax.experimental import pallas as pl
from jax.experimental.pallas import tpu as pltpu

_H1, _H2 = 200, 64           # logical hidden sizes (match the PyTorch module)
_H1_PAD, _H2_PAD = 256, 128  # lane-aligned padded hidden sizes
_LANE = 128


def _round_up(n: int, m: int) -> int:
    return (n + m - 1) // m * m


def _vmem_ceiling_bytes() -> int:
    """Device-aware VMEM cap: physical capacity minus headroom, never >96MiB."""
    try:
        cap = int(pltpu.get_tpu_info().vmem_capacity_bytes)
    except Exception:  # no TPU info available at trace time -> be conservative
        cap = 64 << 20
    return min(max(cap - (16 << 20), 32 << 20), 96 << 20)


def _deep_fnn_kernel(x_ref, w1_ref, b1_ref, w2_ref, b2_ref, w3_ref, b3_ref, o_ref):
    # Cast x to bf16 *inside* the kernel (x is DMA'd as f32). MXU matmuls run
    # bf16 x bf16 -> f32 accumulation; bias add + ReLU stay in f32.
    x = x_ref[...].astype(jnp.bfloat16)
    # fc1 + ReLU
    h1 = jnp.dot(x, w1_ref[...], preferred_element_type=jnp.float32)
    h1 = jnp.maximum(h1 + b1_ref[...], 0.0).astype(jnp.bfloat16)
    # fc2 + ReLU
    h2 = jnp.dot(h1, w2_ref[...], preferred_element_type=jnp.float32)
    h2 = jnp.maximum(h2 + b2_ref[...], 0.0).astype(jnp.bfloat16)
    # fc3 (no activation); store bf16 (lane-dense 128-wide tile)
    h3 = jnp.dot(h2, w3_ref[...], preferred_element_type=jnp.float32)
    o_ref[...] = (h3 + b3_ref[...]).astype(o_ref.dtype)


def deep_fnn_forward(x, params, *, tb_max=2048):
    """Fused forward pass of DeepFNN.

    x: (B, input_dim) float32
    params: dict with w1 (in,200), b1 (200,), w2 (200,64), b2 (64,),
            w3 (64,out), b3 (out,)   (weights stored transposed vs. PyTorch)
    Returns (B, output_dim) float32.
    """
    w1, b1 = params["w1"], params["b1"]
    w2, b2 = params["w2"], params["b2"]
    w3, b3 = params["w3"], params["b3"]

    B, in_dim = x.shape
    out_dim = w3.shape[1]
    out_pad = _round_up(out_dim, _LANE)

    # --- batch tiling: TB multiple of 16 (bf16 sublane packing), pad B up ----
    tb = min(int(tb_max), _round_up(B, 16))
    tb = _round_up(tb, 16)
    # Prefer >= 2 grid tiles (when the batch is big enough) so the "parallel"
    # batch axis can split across both TensorCores on v7x.
    if B > 16 and _round_up(B, tb) == tb:
        tb = _round_up((tb + 1) // 2, 16)
    pb = _round_up(B, tb)
    n_tiles = pb // tb

    # --- pad operands; x stays f32 (cast happens in-kernel), weights -> bf16 -
    x_p = x
    if pb != B:
        x_p = jnp.pad(x_p, ((0, pb - B), (0, 0)))
    x_p = x_p.astype(jnp.float32)

    w1_p = jnp.pad(w1, ((0, 0), (0, _H1_PAD - _H1))).astype(jnp.bfloat16)
    w2_p = jnp.pad(w2, ((0, _H1_PAD - _H1), (0, _H2_PAD - _H2))).astype(jnp.bfloat16)
    w3_p = jnp.pad(w3, ((0, _H2_PAD - _H2), (0, out_pad - out_dim))).astype(jnp.bfloat16)

    b1_p = jnp.pad(b1, (0, _H1_PAD - _H1)).reshape(1, -1).astype(jnp.float32)
    b2_p = jnp.pad(b2, (0, _H2_PAD - _H2)).reshape(1, -1).astype(jnp.float32)
    b3_p = jnp.pad(b3, (0, out_pad - out_dim)).reshape(1, -1).astype(jnp.float32)

    # --- VMEM budget (no outer 2x: io tiles already counted double-buffered) -
    io_bytes = 2 * (tb * in_dim * 4 + tb * out_pad * 2)      # f32 in, bf16 out
    w_bytes = 2 * 2 * (in_dim * _H1_PAD + _H1_PAD * _H2_PAD + _H2_PAD * out_pad)
    b_bytes = 2 * 4 * (_H1_PAD + _H2_PAD + out_pad)
    tmp_bytes = tb * (2 * in_dim                              # bf16 x cast
                      + 6 * _H1_PAD + 6 * _H2_PAD             # f32 + bf16 h1/h2
                      + 4 * out_pad)                          # f32 h3
    vmem_limit = min(
        max(io_bytes + w_bytes + b_bytes + tmp_bytes + (4 << 20), 16 << 20),
        _vmem_ceiling_bytes())

    cost = pl.CostEstimate(
        flops=2 * pb * (in_dim * _H1_PAD + _H1_PAD * _H2_PAD + _H2_PAD * out_pad),
        transcendentals=0,
        bytes_accessed=(pb * in_dim * 4 + pb * out_pad * 2
                        + 2 * (in_dim * _H1_PAD + _H1_PAD * _H2_PAD + _H2_PAD * out_pad)),
    )

    const2d = lambda i: (0, 0)  # weights / biases: resident in VMEM across the grid

    out_p = pl.pallas_call(
        _deep_fnn_kernel,
        out_shape=jax.ShapeDtypeStruct((pb, out_pad), jnp.bfloat16),
        grid=(n_tiles,),
        in_specs=[
            pl.BlockSpec((tb, in_dim), lambda i: (i, 0)),       # x tile (f32)
            pl.BlockSpec((in_dim, _H1_PAD), const2d),           # w1
            pl.BlockSpec((1, _H1_PAD), const2d),                # b1
            pl.BlockSpec((_H1_PAD, _H2_PAD), const2d),          # w2
            pl.BlockSpec((1, _H2_PAD), const2d),                # b2
            pl.BlockSpec((_H2_PAD, out_pad), const2d),          # w3
            pl.BlockSpec((1, out_pad), const2d),                # b3
        ],
        out_specs=pl.BlockSpec((tb, out_pad), lambda i: (i, 0)),
        compiler_params=pltpu.CompilerParams(
            dimension_semantics=("parallel",),
            vmem_limit_bytes=vmem_limit,
        ),
        cost_estimate=cost,
    )(x_p, w1_p, b1_p, w2_p, b2_p, w3_p, b3_p)

    # Slice away batch / feature padding; restore the module's f32 output dtype.
    return out_p[:B, :out_dim].astype(jnp.float32)


def init_params(key, input_dim, output_dim):
    """Deterministic init mirroring nn.Linear shapes (stored transposed)."""
    ks = jax.random.split(key, 6)

    def linear(kw, kb, fan_in, fan_out):
        bound = 1.0 / jnp.sqrt(fan_in)
        w = jax.random.uniform(kw, (fan_in, fan_out), jnp.float32, -bound, bound)
        b = jax.random.uniform(kb, (fan_out,), jnp.float32, -bound, bound)
        return w, b

    w1, b1 = linear(ks[0], ks[1], input_dim, _H1)
    w2, b2 = linear(ks[2], ks[3], _H1, _H2)
    w3, b3 = linear(ks[4], ks[5], _H2, output_dim)
    return {"w1": w1, "b1": b1, "w2": w2, "b2": b2, "w3": w3, "b3": b3}


def _reference_forward(x, p):
    h = jnp.maximum(x @ p["w1"] + p["b1"], 0.0)
    h = jnp.maximum(h @ p["w2"] + p["b2"], 0.0)
    return h @ p["w3"] + p["b3"]


if __name__ == "__main__":
    key = jax.random.PRNGKey(0)
    k_x, k_p = jax.random.split(key)

    # Small demo shapes (note: at B=8 this is launch-overhead bound; the tiled
    # grid / bf16 / megacore optimizations pay off at B in the thousands).
    batch, input_dim, output_dim = 8, 32, 4
    x = jax.random.normal(k_x, (batch, input_dim), jnp.float32)
    params = init_params(k_p, input_dim, output_dim)

    fwd = jax.jit(functools.partial(deep_fnn_forward, tb_max=2048))
    out = jax.block_until_ready(fwd(x, params))

    ref = _reference_forward(x, params)
    assert out.shape == (batch, output_dim)
    # bf16 matmul inputs / bf16 output store with f32 accumulation vs f32 ref.
    assert jnp.allclose(out, ref, atol=3e-2, rtol=2e-2), (
        float(jnp.max(jnp.abs(out - ref))))

    # Also exercise a batch that is not a multiple of the tile size and that
    # takes the >= 2-tile (megacore-splittable) path.
    x_big = jax.random.normal(k_x, (1037, input_dim), jnp.float32)
    out_big = jax.block_until_ready(fwd(x_big, params))
    ref_big = _reference_forward(x_big, params)
    assert out_big.shape == (1037, output_dim)
    assert jnp.allclose(out_big, ref_big, atol=3e-2, rtol=2e-2)

    print("KERNEL_OK")
</pallas_src>

<mosaic_0001>
module attributes {stable_mosaic.version = 11 : i64} {
  func.func @_deep_fnn_kernel(%arg0: i32, %arg1: memref<16x32xf32, #tpu.memory_space<vmem>>, %arg2: memref<32x256xbf16, #tpu.memory_space<vmem>>, %arg3: memref<1x256xf32, #tpu.memory_space<vmem>>, %arg4: memref<256x128xbf16, #tpu.memory_space<vmem>>, %arg5: memref<1x128xf32, #tpu.memory_space<vmem>>, %arg6: memref<128x128xbf16, #tpu.memory_space<vmem>>, %arg7: memref<1x128xf32, #tpu.memory_space<vmem>>, %arg8: memref<16x128xbf16, #tpu.memory_space<vmem>>) attributes {dimension_semantics = [#tpu.dimension_semantics<parallel>], iteration_bounds = array<i64: 1>, scalar_prefetch = 0 : i64, scratch_operands = 0 : i64, tpu.core_type = #tpu.core_type<tc>, window_params = [{transform_indices = @transform_0, window_bounds = array<i64: 16, 32>}, {pipeline_mode = #tpu.pipeline_mode<synchronous>, transform_indices = @transform_1, window_bounds = array<i64: 32, 256>}, {pipeline_mode = #tpu.pipeline_mode<synchronous>, transform_indices = @transform_2, window_bounds = array<i64: 1, 256>}, {pipeline_mode = #tpu.pipeline_mode<synchronous>, transform_indices = @transform_3, window_bounds = array<i64: 256, 128>}, {pipeline_mode = #tpu.pipeline_mode<synchronous>, transform_indices = @transform_4, window_bounds = array<i64: 1, 128>}, {pipeline_mode = #tpu.pipeline_mode<synchronous>, transform_indices = @transform_5, window_bounds = array<i64: 128, 128>}, {pipeline_mode = #tpu.pipeline_mode<synchronous>, transform_indices = @transform_6, window_bounds = array<i64: 1, 128>}, {transform_indices = @transform_7, window_bounds = array<i64: 16, 128>}]} {
    %c0 = arith.constant 0 : index
    %c0_0 = arith.constant 0 : index
    %0 = vector.load %arg1[%c0, %c0_0] : memref<16x32xf32, #tpu.memory_space<vmem>>, vector<16x32xf32>
    %1 = arith.truncf %0 : vector<16x32xf32> to vector<16x32xbf16>
    %c0_1 = arith.constant 0 : index
    %c0_2 = arith.constant 0 : index
    %2 = vector.load %arg2[%c0_1, %c0_2] : memref<32x256xbf16, #tpu.memory_space<vmem>>, vector<32x256xbf16>
    %cst = arith.constant dense<0.000000e+00> : vector<16x256xf32>
    %3 = tpu.matmul %1, %2, %cst {dimension_numbers = #tpu.dot_dimension_numbers<[1], [0], [0], [1], [0, 0, 1, 1], [], []>} : vector<16x32xbf16>, vector<32x256xbf16>, vector<16x256xf32> -> vector<16x256xf32>
    %c0_3 = arith.constant 0 : index
    %c0_4 = arith.constant 0 : index
    %4 = vector.load %arg3[%c0_3, %c0_4] : memref<1x256xf32, #tpu.memory_space<vmem>>, vector<1x256xf32>
    %5 = vector.broadcast %4 : vector<1x256xf32> to vector<16x256xf32>
    %6 = arith.addf %3, %5 : vector<16x256xf32>
    %cst_5 = arith.constant 0.000000e+00 : f32
    %7 = vector.broadcast %cst_5 : f32 to vector<16x256xf32>
    %8 = arith.maximumf %6, %7 : vector<16x256xf32>
    %9 = arith.truncf %8 : vector<16x256xf32> to vector<16x256xbf16>
    %c0_6 = arith.constant 0 : index
    %c0_7 = arith.constant 0 : index
    %10 = vector.load %arg4[%c0_6, %c0_7] : memref<256x128xbf16, #tpu.memory_space<vmem>>, vector<256x128xbf16>
    %cst_8 = arith.constant dense<0.000000e+00> : vector<16x128xf32>
    %11 = tpu.matmul %9, %10, %cst_8 {dimension_numbers = #tpu.dot_dimension_numbers<[1], [0], [0], [1], [0, 0, 1, 1], [], []>} : vector<16x256xbf16>, vector<256x128xbf16>, vector<16x128xf32> -> vector<16x128xf32>
    %c0_9 = arith.constant 0 : index
    %c0_10 = arith.constant 0 : index
    %12 = vector.load %arg5[%c0_9, %c0_10] : memref<1x128xf32, #tpu.memory_space<vmem>>, vector<1x128xf32>
    %13 = vector.broadcast %12 : vector<1x128xf32> to vector<16x128xf32>
    %14 = arith.addf %11, %13 : vector<16x128xf32>
    %cst_11 = arith.constant 0.000000e+00 : f32
    %15 = vector.broadcast %cst_11 : f32 to vector<16x128xf32>
    %16 = arith.maximumf %14, %15 : vector<16x128xf32>
    %17 = arith.truncf %16 : vector<16x128xf32> to vector<16x128xbf16>
    %c0_12 = arith.constant 0 : index
    %c0_13 = arith.constant 0 : index
    %18 = vector.load %arg6[%c0_12, %c0_13] : memref<128x128xbf16, #tpu.memory_space<vmem>>, vector<128x128xbf16>
    %cst_14 = arith.constant dense<0.000000e+00> : vector<16x128xf32>
    %19 = tpu.matmul %17, %18, %cst_14 {dimension_numbers = #tpu.dot_dimension_numbers<[1], [0], [0], [1], [0, 0, 1, 1], [], []>} : vector<16x128xbf16>, vector<128x128xbf16>, vector<16x128xf32> -> vector<16x128xf32>
    %c0_15 = arith.constant 0 : index
    %c0_16 = arith.constant 0 : index
    %20 = vector.load %arg7[%c0_15, %c0_16] : memref<1x128xf32, #tpu.memory_space<vmem>>, vector<1x128xf32>
    %21 = vector.broadcast %20 : vector<1x128xf32> to vector<16x128xf32>
    %22 = arith.addf %19, %21 : vector<16x128xf32>
    %23 = arith.truncf %22 : vector<16x128xf32> to vector<16x128xbf16>
    %c0_17 = arith.constant 0 : index
    %c0_18 = arith.constant 0 : index
    %24 = vector.load %arg8[%c0_17, %c0_18] : memref<16x128xbf16, #tpu.memory_space<vmem>>, vector<16x128xbf16>
    tpu.vector_store %arg8[%c0_17, %c0_18], %23 {strides = array<i32>} : memref<16x128xbf16, #tpu.memory_space<vmem>>, vector<16x128xbf16>,
    return
  }
  func.func @transform_0(%arg0: i32) -> (i32, i32) {
    %c0_i32 = arith.constant 0 : i32
    %c0_i32_0 = arith.constant 0 : i32
    return %arg0, %c0_i32 : i32, i32
  }
  func.func @transform_1(%arg0: i32) -> (i32, i32) {
    %c0_i32 = arith.constant 0 : i32
    %c0_i32_0 = arith.constant 0 : i32
    %c0_i32_1 = arith.constant 0 : i32
    return %c0_i32, %c0_i32_0 : i32, i32
  }
  func.func @transform_2(%arg0: i32) -> (i32, i32) {
    %c0_i32 = arith.constant 0 : i32
    %c0_i32_0 = arith.constant 0 : i32
    %c0_i32_1 = arith.constant 0 : i32
    return %c0_i32, %c0_i32_0 : i32, i32
  }
  func.func @transform_3(%arg0: i32) -> (i32, i32) {
    %c0_i32 = arith.constant 0 : i32
    %c0_i32_0 = arith.constant 0 : i32
    %c0_i32_1 = arith.constant 0 : i32
    return %c0_i32, %c0_i32_0 : i32, i32
  }
  func.func @transform_4(%arg0: i32) -> (i32, i32) {
    %c0_i32 = arith.constant 0 : i32
    %c0_i32_0 = arith.constant 0 : i32
    %c0_i32_1 = arith.constant 0 : i32
    return %c0_i32, %c0_i32_0 : i32, i32
  }
  func.func @transform_5(%arg0: i32) -> (i32, i32) {
    %c0_i32 = arith.constant 0 : i32
    %c0_i32_0 = arith.constant 0 : i32
    %c0_i32_1 = arith.constant 0 : i32
    return %c0_i32, %c0_i32_0 : i32, i32
  }
  func.func @transform_6(%arg0: i32) -> (i32, i32) {
    %c0_i32 = arith.constant 0 : i32
    %c0_i32_0 = arith.constant 0 : i32
    %c0_i32_1 = arith.constant 0 : i32
    return %c0_i32, %c0_i32_0 : i32, i32
  }
  func.func @transform_7(%arg0: i32) -> (i32, i32) {
    %c0_i32 = arith.constant 0 : i32
    %c0_i32_0 = arith.constant 0 : i32
    return %arg0, %c0_i32 : i32, i32
  }
}

</mosaic_0001>

<bundles_post_ra>
// kernel: deep_fnn_forward.1
= control target key start
LH: loop header
LB: loop body
LE: loop exit
PB: predicated region body
PF: predicated region fallthrough
CT: control target
= control target key end

     0   :  { %vm60_vm0 = vcmask 261120   ;;  %s654_s1 = inlined_call_operand.vmem [shape: bf16[32,256], index: 1, kind: input, shape index: {}]   ;;  %s655_s0 = inlined_call_operand.vmem [shape: f32[16,32], index: 0, kind: input, shape index: {}]   ;;  %s656_s3 = inlined_call_operand.vmem [shape: bf16[256,128], index: 3, kind: input, shape index: {}]   ;;  %s657_s4 = inlined_call_operand.vmem [shape: f32[1,128], index: 4, kind: input, shape index: {}]   ;;  %s658_s2 = inlined_call_operand.vmem [shape: f32[1,256], index: 2, kind: input, shape index: {}]   ;;  %s659_s6 = inlined_call_operand.vmem [shape: f32[1,128], index: 6, kind: input, shape index: {}]   ;;  %s660_s5 = inlined_call_operand.vmem [shape: bf16[128,128], index: 5, kind: input, shape index: {}]   ;;  %s661_s7 = inlined_call_operand.vmem [shape: bf16[16,128], index: 7, kind: output, shape index: {}]  }
   0x1   :  { %v361_v0 = vld [vmem:[%s654_s1 + $0x10] sm:$0xf]  ;;  %v468_v1 = vld [vmem:[%s654_s1 + $0x14] sm:$0xf0]  ;;  %v353_v2 = vld [vmem:[%s654_s1] sm:$0xf] }
   0x2   :  { %v362_v3 = vor.u32 %v468_v1, %v361_v0  ;;  %v466_v4 = vld [vmem:[%s654_s1 + $0x4] sm:$0xf0]  ;;  %v467_v5 = vld [vmem:[%s654_s1 + $0x14] sm:$0xf]  ;;  %v363_v6 = vld [vmem:[%s654_s1 + $0x18] sm:$0xf0] }
   0x3   :  { %v354_v7 = vor.u32 %v466_v4, %v353_v2  ;;  %v27_v8 = vld [vmem:[%s655_s0] sm:$0xff]  ;;  %v28_v9 = vld [vmem:[%s655_s0 + $0x8] sm:$0xff]  ;;  %v476_v10 = vld [vmem:[%s656_s3 + $0x38] sm:$0xff]  ;;  %v366_v11 = vor.u32 %v467_v5, %v363_v6 }
   0x4   :  { %70 = vmatpush.bf16.msra.mxu1 %v362_v3  ;;  %v465_v12 = vld [vmem:[%s654_s1 + $0x4] sm:$0xf]  ;;  %v355_v13 = vld [vmem:[%s654_s1 + $0x8] sm:$0xf0]  ;;  %230 = vmatpush.bf16.msra.mxu2 %v476_v10  ;;  %v475_v14 = vld [vmem:[%s656_s3 + $0x30] sm:$0xff]  ;;  %v29_v15 = vpack.c.bf16 %v28_v9, %v27_v8 }
   0x5   :  { %v358_v16 = vor.u32 %v465_v12, %v355_v13  ;;  %v474_v17 = vld [vmem:[%s656_s3 + $0x28] sm:$0xff]  ;;  %v473_v18 = vld [vmem:[%s656_s3 + $0x20] sm:$0xff]  ;;  %v472_v19 = vld [vmem:[%s656_s3 + $0x18] sm:$0xff] }
   0x6   :  { %v484_v20 = vld [vmem:[%s656_s3 + $0x78] sm:$0xff]  ;;  %v471_v21 = vld [vmem:[%s656_s3 + $0x10] sm:$0xff]  ;;  %v470_v23 = vld [vmem:[%s656_s3 + $0x8] sm:$0xff] }
   0x7   :  { %244 = vmatpush.bf16.msra.mxu3 %v484_v20  ;;  %v483_v22 = vld [vmem:[%s656_s3 + $0x70] sm:$0xff]  ;;  %v482_v24 = vld [vmem:[%s656_s3 + $0x68] sm:$0xff]  ;;  %v469_v25 = vld [vmem:[%s656_s3] sm:$0xff] }
   0x8   :  { %71 = vmatpush.bf16.msra.mxu1 %v354_v7  ;;  %231 = vmatpush.bf16.msra.mxu2 %v475_v14  ;;  %v481_v26 = vld [vmem:[%s656_s3 + $0x60] sm:$0xff]  ;;  %v480_v27 = vld [vmem:[%s656_s3 + $0x58] sm:$0xff]  ;;  %v479_v28 = vld [vmem:[%s656_s3 + $0x50] sm:$0xff] }
   0x9   :  { %v478_v29 = vld [vmem:[%s656_s3 + $0x48] sm:$0xff]  ;;  %v477_v30 = vld [vmem:[%s656_s3 + $0x40] sm:$0xff]  ;;  %v492_v48 = vld [vmem:[%s660_s5 + $0x38] sm:$0xff] }
   0xa   :  { %v34_v31 = vld [vmem:[%s658_s2] sm:$0x3]  ;;  %329 = vmatpush.bf16.msra.mxu0 %v492_v48  ;;  %v491_v49 = vld [vmem:[%s660_s5 + $0x30] sm:$0xff]  ;;  %v490_v50 = vld [vmem:[%s660_s5 + $0x28] sm:$0xff] }
   0xb   :  { %367 = vmatmul.msk.bf16.vlgmr.msra.gmra.mxu1 %vm60_vm0, %v29_v15  ;;  %245 = vmatpush.bf16.msra.mxu3 %v483_v22  ;;  %v36_v33 = vperm.slane %v34_v31, 0  ;;  %v37_v41 = vperm.slane %v34_v31, 1  ;;  %v489_v51 = vld [vmem:[%s660_s5 + $0x20] sm:$0xff]  ;;  %v488_v52 = vld [vmem:[%s660_s5 + $0x18] sm:$0xff]  ;;  %v487_v53 = vld [vmem:[%s660_s5 + $0x10] sm:$0xff] }
   0xc   :  { %84 = vmatpush.bf16.msrb.mxu1 %v366_v11  ;;  %232 = vmatpush.bf16.msra.mxu2 %v474_v17  ;;  %v486_v54 = vld [vmem:[%s660_s5 + $0x8] sm:$0xff]  ;;  %v485_v55 = vld [vmem:[%s660_s5] sm:$0xff] }
   0xd   :  { %v498_v58 = vld [vmem:[%s657_s4] ss:$0 sm:$0xff] }
   0xe   :  { %330 = vmatpush.bf16.msra.mxu0 %v491_v49  ;;  %v499_v5 = vld [vmem:[%s659_s6] ss:$0 sm:$0xff] }
   0xf   :  { %246 = vmatpush.bf16.msra.mxu3 %v482_v24 }
  0x10   :  { %85 = vmatpush.bf16.msrb.mxu1 %v358_v16  ;;  %233 = vmatpush.bf16.msra.mxu2 %v473_v18 }
  0x12   :  { %331 = vmatpush.bf16.msra.mxu0 %v490_v50 }
  0x13   :  { %247 = vmatpush.bf16.msra.mxu3 %v481_v26 }
  0x14   :  { %234 = vmatpush.bf16.msra.mxu2 %v472_v19 }
  0x16   :  { %332 = vmatpush.bf16.msra.mxu0 %v489_v51 }
  0x17   :  { %248 = vmatpush.bf16.msra.mxu3 %v480_v27 }
  0x18   :  { %235 = vmatpush.bf16.msra.mxu2 %v471_v21 }
  0x1a   :  { %333 = vmatpush.bf16.msra.mxu0 %v488_v52 }
  0x1b   :  { %368 = vmatmul.msk.bf16.vlgmr.msrb.gmra.mxu1 %vm60_vm0, %v29_v15  ;;  %249 = vmatpush.bf16.msra.mxu3 %v479_v28 }
  0x1c   :  { %236 = vmatpush.bf16.msra.mxu2 %v470_v23 }
  0x1e   :  { %334 = vmatpush.bf16.msra.mxu0 %v487_v53 }
  0x1f   :  { %250 = vmatpush.bf16.msra.mxu3 %v478_v29 }
  0x20   :  { %237 = vmatpush.bf16.msra.mxu2 %v469_v25 }
  0x22   :  { %335 = vmatpush.bf16.msra.mxu0 %v486_v54 }
  0x23   :  { %251 = vmatpush.bf16.msra.mxu3 %v477_v30 }
  0x26   :  { %336 = vmatpush.bf16.msra.mxu0 %v485_v55 }
  0x88   :  { %v73_v32 = vpop.f32.mrf.mxu1 }
  0x89   :  { %v74_v34 = vadd.f32 %v73_v32, %v36_v33 }
  0x8b   :  { %v92_v37 = vmax.f32 %v74_v34, 0.0 }
  0x90   :  { %v75_v35 = vpop.f32.mrf.mxu1 }
  0x91   :  { %v76_v36 = vadd.f32 %v75_v35, %v36_v33 }
  0x93   :  { %v94_v38 = vmax.f32 %v76_v36, 0.0 }
  0x95   :  { %v96_v39 = vpack.c.bf16 %v94_v38, %v92_v37 }
  0x97   :  { %238 = vmatmul.bf16.vlgmr.msra.gmra.mxu2 %v96_v39 }
  0x98   :  { %v87_v40 = vpop.f32.mrf.mxu1 }
  0x99   :  { %v88_v42 = vadd.f32 %v87_v40, %v37_v41 }
  0x9b   :  { %v93_v45 = vmax.f32 %v88_v42, 0.0 }
  0xa0   :  { %v89_v43 = vpop.f32.mrf.mxu1 }
  0xa1   :  { %v90_v44 = vadd.f32 %v89_v43, %v37_v41 }
  0xa3   :  { %v95_v46 = vmax.f32 %v90_v44, 0.0 }
  0xa5   :  { %v97_v47 = vpack.c.bf16 %v95_v46, %v93_v45 }
  0xa7   :  { %252 = vmatmul.bf16.vlgmr.msra.gmra.mxu3 %v97_v47 }
 0x11a   :  { %v239_v56 = vpop.f32.mrf.mxu2 }
 0x11b   :  { %v240_v60 = vadd.f32 %v498_v58, %v239_v56 }
 0x122   :  { %v241_v59 = vpop.f32.mrf.mxu2 }
 0x123   :  { %v242_v61 = vadd.f32 %v498_v58, %v241_v59 }
 0x12a   :  { %v253_v57 = vpop.f32.mrf.mxu3 }
 0x12b   :  { %v254_v62 = vadd.f32 %v253_v57, %v240_v60 }
 0x12d   :  { %v258_v1 = vmax.f32 %v254_v62, 0.0 }
 0x132   :  { %v255_v63 = vpop.f32.mrf.mxu3 }
 0x133   :  { %v256_v0 = vadd.f32 %v255_v63, %v242_v61 }
 0x135   :  { %v259_v2 = vmax.f32 %v256_v0, 0.0 }
 0x137   :  { %v260_v3 = vpack.c.bf16 %v259_v2, %v258_v1 }
 0x139   :  { %337 = vmatmul.bf16.vlgmr.msra.gmra.mxu0 %v260_v3 }
 0x1b6   :  { %v338_v4 = vpop.f32.mrf.mxu0 }
 0x1b7   :  { %v339_v7 = vadd.f32 %v499_v5, %v338_v4 }
 0x1be   :  { %v340_v6 = vpop.f32.mrf.mxu0 }
 0x1bf   :  { %v341_v8 = vadd.f32 %v499_v5, %v340_v6 }
 0x1c1   :  { %v496_v9 = vpack.c.bf16 %v341_v8, %v339_v7 }
 0x1c3   :  { %497 = vst [vmem:[%s661_s7] sm:$0xff] %v496_v9  }

</bundles_post_ra>
